<compile_context>
chip_gen: v7x
topology: tpu7x:2x2x1
jax: 0.10.0
libtpu: 0.0.40
codegen_flags: <defaults>
</compile_context>

<pallas_src>
import functools

import jax
import jax.numpy as jnp
from jax import lax
from jax.experimental import pallas as pl
from jax.experimental.pallas import tpu as pltpu

ALPHA = 1.0  # ELU alpha


def _elu(x):
    return jnp.where(x > 0, x, ALPHA * (jnp.exp(x) - 1.0))


def _kernel(x_ref, halo_ref, w1_ref, b1_ref, w2_ref, b2_ref, out_ref):
    # x_ref:    (1, C, TT)   input tile, NCT layout (time on lanes)
    # halo_ref: (1, 1, C, 2) [left, right] neighbor columns (reflect at edges)
    # w1_ref:   (3H, C)      fused conv1 taps [W0; W1; W2]
    # b1_ref:   (H, 1)       f32
    # w2_ref:   (C, H)       conv2 (1x1) weight
    # b2_ref:   (C, 1)       f32
    # out_ref:  (1, C, TT)
    TT = out_ref.shape[2]
    H = b1_ref.shape[0]

    x = x_ref[0]                       # (C, TT) raw tile -> residual
    a = _elu(x)                        # ELU(x), main tile
    a_halo = _elu(halo_ref[0, 0])      # (C, 2)  ELU of neighbor/reflect columns

    w1 = w1_ref[...]                   # (3H, C), dtype hoisted in wrapper
    # One MXU weight push for all three taps.
    hh = jnp.dot(w1, a, preferred_element_type=jnp.float32)        # (3H, TT)
    hb = jnp.dot(w1, a_halo, preferred_element_type=jnp.float32)   # (3H, 2)

    h0 = hh[0:H]          # tap 0 applied at column j -> contributes to out col j+1
    h1 = hh[H:2 * H]      # tap 1, aligned
    h2 = hh[2 * H:3 * H]  # tap 2 applied at column j -> contributes to out col j-1

    # Lane shifts on the XLU; boundary columns replaced with the halo dots.
    h0r = pltpu.roll(h0, 1, 1)          # shift right by 1
    h2l = pltpu.roll(h2, TT - 1, 1)     # shift left by 1
    col = lax.broadcasted_iota(jnp.int32, (H, TT), 1)
    h0r = jnp.where(col == 0, hb[0:H, 0:1], h0r)                    # W0 @ a_left
    h2l = jnp.where(col == TT - 1, hb[2 * H:3 * H, 1:2], h2l)       # W2 @ a_right

    h = _elu(h0r + h1 + h2l + b1_ref[...])                          # (H, TT), f32

    w2 = w2_ref[...]
    y = jnp.dot(w2, h.astype(w2.dtype),
                preferred_element_type=jnp.float32) + b2_ref[...]   # (C, TT)

    # true_skip=True -> Identity shortcut
    out_ref[0] = (x.astype(jnp.float32) + y).astype(out_ref.dtype)


def seanet_resnet_block(x_nct, w1_eff, b1, w2_eff, b2, *,
                        t_tile=None, use_bf16=False):
    """x_nct: (B, C, T) float32, PyTorch NCT layout (kept end-to-end).
    w1_eff: (H, C, 3) effective conv1 weight (after weight_norm reparam).
    w2_eff: (C, H, 1) effective conv2 weight.
    use_bf16: bf16 activations/weights at the pallas_call boundary (v6e/v7x).
    Returns (B, C, T) float32."""
    B, C, T = x_nct.shape
    H = w1_eff.shape[0]
    assert T >= 2, "reflect padding needs T >= 2"

    compute_dtype = jnp.bfloat16 if use_bf16 else jnp.float32
    x = x_nct.astype(jnp.float32)

    # --- time tiling: lane-dense tiles, minimal right padding ---
    tpad128 = -(-T // 128) * 128
    if t_tile is None:
        t_tile = 128
        for cand in (1024, 512, 256, 128):   # <=1024: safe for v7x's 64 MiB VMEM
            if tpad128 % cand == 0:
                t_tile = cand
                break
    assert t_tile % 128 == 0, "t_tile must be a multiple of 128"
    Tpad = -(-T // t_tile) * t_tile
    nT = Tpad // t_tile

    # --- right-pad (only when needed) and plant the reflect value at column T,
    #     so output column T-1 reads the correct right neighbor from inside its tile.
    if Tpad != T:
        xp = jnp.pad(x, ((0, 0), (0, 0), (0, Tpad - T)))
        xp = xp.at[:, :, T].set(x[:, :, T - 2])
    else:
        xp = x

    # --- per-tile halo columns (left/right neighbor incl. reflect); tiny array ---
    left_idx = jnp.array([1] + [t * t_tile - 1 for t in range(1, nT)],
                         dtype=jnp.int32)
    right_idx = jnp.array([(t + 1) * t_tile for t in range(nT - 1)] + [T - 2],
                          dtype=jnp.int32)
    halo = jnp.stack([jnp.take(x, left_idx, axis=2),
                      jnp.take(x, right_idx, axis=2)], axis=-1)     # (B, C, nT, 2)
    halo = jnp.transpose(halo, (0, 2, 1, 3))                        # (B, nT, C, 2)

    # --- weights: fused (3H, C) tap matrix; dtype casts hoisted here ---
    w1_fused = jnp.transpose(w1_eff, (2, 0, 1)).reshape(3 * H, C)   # [W0;W1;W2]
    w2_mat = w2_eff[:, :, 0]                                        # (C, H)
    b1_col = b1.reshape(H, 1).astype(jnp.float32)
    b2_col = b2.reshape(C, 1).astype(jnp.float32)

    xp = xp.astype(compute_dtype)
    halo = halo.astype(compute_dtype)
    w1_fused = w1_fused.astype(compute_dtype)
    w2_mat = w2_mat.astype(compute_dtype)

    out = pl.pallas_call(
        _kernel,
        out_shape=jax.ShapeDtypeStruct((B, C, Tpad), jnp.float32),
        grid_spec=pltpu.PrefetchScalarGridSpec(
            num_scalar_prefetch=0,
            grid=(B, nT),
            in_specs=[
                pl.BlockSpec((1, C, t_tile), lambda b, t: (b, 0, t)),
                pl.BlockSpec((1, 1, C, 2), lambda b, t: (b, t, 0, 0)),
                pl.BlockSpec((3 * H, C), lambda b, t: (0, 0)),
                pl.BlockSpec((H, 1), lambda b, t: (0, 0)),
                pl.BlockSpec((C, H), lambda b, t: (0, 0)),
                pl.BlockSpec((C, 1), lambda b, t: (0, 0)),
            ],
            out_specs=pl.BlockSpec((1, C, t_tile), lambda b, t: (b, 0, t)),
        ),
        compiler_params=pltpu.CompilerParams(
            dimension_semantics=("parallel", "parallel"),
            vmem_limit_bytes=48 * 1024 * 1024,   # >=32 MiB (v5e default is 16), <64 MiB (v7x)
        ),
    )(xp, halo, w1_fused, b1_col, w2_mat, b2_col)

    if Tpad != T:
        out = out[:, :, :T]
    return out


def _weight_norm(v, g):
    # PyTorch weight_norm, dim=0: w = g * v / ||v|| with norm over all dims but 0
    norm = jnp.sqrt(jnp.sum(v * v, axis=tuple(range(1, v.ndim)), keepdims=True))
    return g.reshape((-1,) + (1,) * (v.ndim - 1)) * v / norm


def _reference(x_nct, w1_eff, b1, w2_eff, b2):
    a = _elu(x_nct)
    a = jnp.pad(a, ((0, 0), (0, 0), (1, 1)), mode="reflect")
    h = lax.conv_general_dilated(a, w1_eff, (1,), "VALID",
                                 dimension_numbers=("NCH", "OIH", "NCH"))
    h = h + b1[None, :, None]
    h = _elu(h)
    y = lax.conv_general_dilated(h, w2_eff, (1,), "VALID",
                                 dimension_numbers=("NCH", "OIH", "NCH"))
    y = y + b2[None, :, None]
    return x_nct + y


if __name__ == "__main__":
    key = jax.random.PRNGKey(0)
    k_x, k_v1, k_g1, k_b1, k_v2, k_g2, k_b2, k_x2, k_x3, k_x4 = jax.random.split(key, 10)

    # small shapes consistent with the module: dim=8 (compress=2 -> hidden=4)
    B, DIM, T = 2, 8, 16
    HIDDEN = DIM // 2

    x = jax.random.normal(k_x, (B, DIM, T), dtype=jnp.float32)

    # weight_norm parameterization (g, v) for both convs, deterministic init
    v1 = jax.random.normal(k_v1, (HIDDEN, DIM, 3), dtype=jnp.float32) * 0.3
    g1 = jax.random.uniform(k_g1, (HIDDEN,), minval=0.5, maxval=1.5, dtype=jnp.float32)
    b1 = jax.random.normal(k_b1, (HIDDEN,), dtype=jnp.float32) * 0.1
    v2 = jax.random.normal(k_v2, (DIM, HIDDEN, 1), dtype=jnp.float32) * 0.3
    g2 = jax.random.uniform(k_g2, (DIM,), minval=0.5, maxval=1.5, dtype=jnp.float32)
    b2 = jax.random.normal(k_b2, (DIM,), dtype=jnp.float32) * 0.1

    w1_eff = _weight_norm(v1, g1)  # (HIDDEN, DIM, 3)
    w2_eff = _weight_norm(v2, g2)  # (DIM, HIDDEN, 1)

    fn = jax.jit(seanet_resnet_block, static_argnames=("t_tile", "use_bf16"))

    # Test 1: small T -> padded to one 128-wide tile
    out = jax.block_until_ready(fn(x, w1_eff, b1, w2_eff, b2))
    ref = _reference(x, w1_eff, b1, w2_eff, b2)
    assert out.shape == (B, DIM, T)
    assert jnp.allclose(out, ref, atol=1e-4, rtol=1e-4), "mismatch (T=16)"

    # Test 2: multi-tile halo path (T=384, t_tile=128 -> 3 tiles)
    T2 = 384
    x2 = jax.random.normal(k_x2, (B, DIM, T2), dtype=jnp.float32)
    out2 = jax.block_until_ready(fn(x2, w1_eff, b1, w2_eff, b2, t_tile=128))
    ref2 = _reference(x2, w1_eff, b1, w2_eff, b2)
    assert out2.shape == (B, DIM, T2)
    assert jnp.allclose(out2, ref2, atol=1e-4, rtol=1e-4), "mismatch (T=384, 3 tiles)"

    # Test 3: ragged T (padding + trim) with multiple tiles (T=200, t_tile=128 -> 2 tiles)
    T3 = 200
    x3 = jax.random.normal(k_x3, (B, DIM, T3), dtype=jnp.float32)
    out3 = jax.block_until_ready(fn(x3, w1_eff, b1, w2_eff, b2, t_tile=128))
    ref3 = _reference(x3, w1_eff, b1, w2_eff, b2)
    assert out3.shape == (B, DIM, T3)
    assert jnp.allclose(out3, ref3, atol=1e-4, rtol=1e-4), "mismatch (T=200, padded)"

    # Test 4: bf16 activation/weight path (v6e/v7x recipe), loose tolerance
    T4 = 256
    x4 = jax.random.normal(k_x4, (B, DIM, T4), dtype=jnp.float32)
    out4 = jax.block_until_ready(fn(x4, w1_eff, b1, w2_eff, b2, use_bf16=True))
    ref4 = _reference(x4, w1_eff, b1, w2_eff, b2)
    assert out4.shape == (B, DIM, T4)
    assert bool(jnp.all(jnp.isfinite(out4)))
    assert jnp.allclose(out4, ref4, atol=0.15, rtol=0.1), "mismatch (bf16 path)"

    print("KERNEL_OK")
</pallas_src>

<mosaic_0001>
module attributes {stable_mosaic.version = 11 : i64} {
  func.func @_kernel(%arg0: i32, %arg1: i32, %arg2: memref<1x8x128xf32, #tpu.memory_space<vmem>>, %arg3: memref<1x1x8x2xf32, #tpu.memory_space<vmem>>, %arg4: memref<12x8xf32, #tpu.memory_space<vmem>>, %arg5: memref<4x1xf32, #tpu.memory_space<vmem>>, %arg6: memref<8x4xf32, #tpu.memory_space<vmem>>, %arg7: memref<8x1xf32, #tpu.memory_space<vmem>>, %arg8: memref<1x8x128xf32, #tpu.memory_space<vmem>>) attributes {dimension_semantics = [#tpu.dimension_semantics<parallel>, #tpu.dimension_semantics<parallel>], iteration_bounds = array<i64: 2, 1>, scalar_prefetch = 0 : i64, scratch_operands = 0 : i64, tpu.core_type = #tpu.core_type<tc>, window_params = [{transform_indices = @transform_0, window_bounds = array<i64: 1, 8, 128>}, {transform_indices = @transform_1, window_bounds = array<i64: 1, 1, 8, 2>}, {pipeline_mode = #tpu.pipeline_mode<synchronous>, transform_indices = @transform_2, window_bounds = array<i64: 12, 8>}, {pipeline_mode = #tpu.pipeline_mode<synchronous>, transform_indices = @transform_3, window_bounds = array<i64: 4, 1>}, {pipeline_mode = #tpu.pipeline_mode<synchronous>, transform_indices = @transform_4, window_bounds = array<i64: 8, 4>}, {pipeline_mode = #tpu.pipeline_mode<synchronous>, transform_indices = @transform_5, window_bounds = array<i64: 8, 1>}, {transform_indices = @transform_6, window_bounds = array<i64: 1, 8, 128>}]} {
    %c0 = arith.constant 0 : index
    %c0_0 = arith.constant 0 : index
    %c0_1 = arith.constant 0 : index
    %0 = vector.load %arg2[%c0, %c0_0, %c0_1] : memref<1x8x128xf32, #tpu.memory_space<vmem>>, vector<1x8x128xf32>
    %1 = vector.shape_cast %0 : vector<1x8x128xf32> to vector<8x128xf32>
    %cst = arith.constant 0.000000e+00 : f32
    %2 = vector.broadcast %cst : f32 to vector<8x128xf32>
    %3 = arith.cmpf ogt, %1, %2 : vector<8x128xf32>
    %4 = math.exp %1 : vector<8x128xf32>
    %cst_2 = arith.constant 1.000000e+00 : f32
    %5 = vector.broadcast %cst_2 : f32 to vector<8x128xf32>
    %6 = arith.subf %4, %5 : vector<8x128xf32>
    %cst_3 = arith.constant 1.000000e+00 : f32
    %7 = vector.broadcast %cst_3 : f32 to vector<8x128xf32>
    %8 = arith.mulf %7, %6 : vector<8x128xf32>
    %9 = arith.select %3, %1, %8 : vector<8x128xi1>, vector<8x128xf32>
    %c0_4 = arith.constant 0 : index
    %c0_5 = arith.constant 0 : index
    %c0_6 = arith.constant 0 : index
    %c0_7 = arith.constant 0 : index
    %10 = vector.load %arg3[%c0_4, %c0_5, %c0_6, %c0_7] : memref<1x1x8x2xf32, #tpu.memory_space<vmem>>, vector<1x1x8x2xf32>
    %11 = vector.shape_cast %10 : vector<1x1x8x2xf32> to vector<8x2xf32>
    %cst_8 = arith.constant 0.000000e+00 : f32
    %12 = vector.broadcast %cst_8 : f32 to vector<8x2xf32>
    %13 = arith.cmpf ogt, %11, %12 : vector<8x2xf32>
    %14 = math.exp %11 : vector<8x2xf32>
    %cst_9 = arith.constant 1.000000e+00 : f32
    %15 = vector.broadcast %cst_9 : f32 to vector<8x2xf32>
    %16 = arith.subf %14, %15 : vector<8x2xf32>
    %cst_10 = arith.constant 1.000000e+00 : f32
    %17 = vector.broadcast %cst_10 : f32 to vector<8x2xf32>
    %18 = arith.mulf %17, %16 : vector<8x2xf32>
    %19 = arith.select %13, %11, %18 : vector<8x2xi1>, vector<8x2xf32>
    %c0_11 = arith.constant 0 : index
    %c0_12 = arith.constant 0 : index
    %20 = vector.load %arg4[%c0_11, %c0_12] : memref<12x8xf32, #tpu.memory_space<vmem>>, vector<12x8xf32>
    %cst_13 = arith.constant dense<0.000000e+00> : vector<12x128xf32>
    %21 = tpu.matmul %20, %9, %cst_13 {dimension_numbers = #tpu.dot_dimension_numbers<[1], [0], [0], [1], [0, 0, 1, 1], [], []>} : vector<12x8xf32>, vector<8x128xf32>, vector<12x128xf32> -> vector<12x128xf32>
    %cst_14 = arith.constant dense<0.000000e+00> : vector<12x2xf32>
    %22 = tpu.matmul %20, %19, %cst_14 {dimension_numbers = #tpu.dot_dimension_numbers<[1], [0], [0], [1], [0, 0, 1, 1], [], []>} : vector<12x8xf32>, vector<8x2xf32>, vector<12x2xf32> -> vector<12x2xf32>
    %23 = vector.extract_strided_slice %21 {offsets = [0, 0], sizes = [4, 128], strides = [1, 1]} : vector<12x128xf32> to vector<4x128xf32>
    %24 = vector.extract_strided_slice %21 {offsets = [4, 0], sizes = [4, 128], strides = [1, 1]} : vector<12x128xf32> to vector<4x128xf32>
    %25 = vector.extract_strided_slice %21 {offsets = [8, 0], sizes = [4, 128], strides = [1, 1]} : vector<12x128xf32> to vector<4x128xf32>
    %c1_i32 = arith.constant 1 : i32
    %26 = tpu.dynamic_rotate %23 by %c1_i32 dim 1 : vector<4x128xf32>, i32 -> vector<4x128xf32>
    %c127_i32 = arith.constant 127 : i32
    %27 = tpu.dynamic_rotate %25 by %c127_i32 dim 1 : vector<4x128xf32>, i32 -> vector<4x128xf32>
    %28 = tpu.iota {dimensions = array<i32: 1>} : vector<4x128xi32>
    %c0_i32 = arith.constant 0 : i32
    %29 = vector.broadcast %c0_i32 : i32 to vector<4x128xi32>
    %30 = arith.cmpi eq, %28, %29 : vector<4x128xi32>
    %31 = vector.extract_strided_slice %22 {offsets = [0, 0], sizes = [4, 1], strides = [1, 1]} : vector<12x2xf32> to vector<4x1xf32>
    %32 = vector.shape_cast %31 : vector<4x1xf32> to vector<4x1xf32>
    %33 = vector.broadcast %32 : vector<4x1xf32> to vector<4x128xf32>
    %34 = arith.select %30, %33, %26 : vector<4x128xi1>, vector<4x128xf32>
    %c127_i32_15 = arith.constant 127 : i32
    %35 = vector.broadcast %c127_i32_15 : i32 to vector<4x128xi32>
    %36 = arith.cmpi eq, %28, %35 : vector<4x128xi32>
    %37 = vector.extract_strided_slice %22 {offsets = [8, 1], sizes = [4, 1], strides = [1, 1]} : vector<12x2xf32> to vector<4x1xf32>
    %38 = vector.shape_cast %37 : vector<4x1xf32> to vector<4x1xf32>
    %39 = vector.broadcast %38 : vector<4x1xf32> to vector<4x128xf32>
    %40 = arith.select %36, %39, %27 : vector<4x128xi1>, vector<4x128xf32>
    %41 = arith.addf %34, %24 : vector<4x128xf32>
    %42 = arith.addf %41, %40 : vector<4x128xf32>
    %c0_16 = arith.constant 0 : index
    %c0_17 = arith.constant 0 : index
    %43 = vector.load %arg5[%c0_16, %c0_17] : memref<4x1xf32, #tpu.memory_space<vmem>>, vector<4x1xf32>
    %44 = vector.broadcast %43 : vector<4x1xf32> to vector<4x128xf32>
    %45 = arith.addf %42, %44 : vector<4x128xf32>
    %cst_18 = arith.constant 0.000000e+00 : f32
    %46 = vector.broadcast %cst_18 : f32 to vector<4x128xf32>
    %47 = arith.cmpf ogt, %45, %46 : vector<4x128xf32>
    %48 = math.exp %45 : vector<4x128xf32>
    %cst_19 = arith.constant 1.000000e+00 : f32
    %49 = vector.broadcast %cst_19 : f32 to vector<4x128xf32>
    %50 = arith.subf %48, %49 : vector<4x128xf32>
    %cst_20 = arith.constant 1.000000e+00 : f32
    %51 = vector.broadcast %cst_20 : f32 to vector<4x128xf32>
    %52 = arith.mulf %51, %50 : vector<4x128xf32>
    %53 = arith.select %47, %45, %52 : vector<4x128xi1>, vector<4x128xf32>
    %c0_21 = arith.constant 0 : index
    %c0_22 = arith.constant 0 : index
    %54 = vector.load %arg6[%c0_21, %c0_22] : memref<8x4xf32, #tpu.memory_space<vmem>>, vector<8x4xf32>
    %cst_23 = arith.constant dense<0.000000e+00> : vector<8x128xf32>
    %55 = tpu.matmul %54, %53, %cst_23 {dimension_numbers = #tpu.dot_dimension_numbers<[1], [0], [0], [1], [0, 0, 1, 1], [], []>} : vector<8x4xf32>, vector<4x128xf32>, vector<8x128xf32> -> vector<8x128xf32>
    %c0_24 = arith.constant 0 : index
    %c0_25 = arith.constant 0 : index
    %56 = vector.load %arg7[%c0_24, %c0_25] : memref<8x1xf32, #tpu.memory_space<vmem>>, vector<8x1xf32>
    %57 = vector.broadcast %56 : vector<8x1xf32> to vector<8x128xf32>
    %58 = arith.addf %55, %57 : vector<8x128xf32>
    %59 = arith.addf %1, %58 : vector<8x128xf32>
    %c0_26 = arith.constant 0 : index
    %c0_27 = arith.constant 0 : index
    %c0_28 = arith.constant 0 : index
    %60 = vector.load %arg8[%c0_26, %c0_27, %c0_28] : memref<1x8x128xf32, #tpu.memory_space<vmem>>, vector<1x8x128xf32>
    %61 = vector.shape_cast %60 : vector<1x8x128xf32> to vector<8x128xf32>
    %62 = vector.shape_cast %59 : vector<8x128xf32> to vector<1x8x128xf32>
    tpu.vector_store %arg8[%c0_26, %c0_27, %c0_28], %62 {strides = array<i32>} : memref<1x8x128xf32, #tpu.memory_space<vmem>>, vector<1x8x128xf32>,
    return
  }
  func.func @transform_0(%arg0: i32, %arg1: i32) -> (i32, i32, i32) {
    %c0_i32 = arith.constant 0 : i32
    %c0_i32_0 = arith.constant 0 : i32
    return %arg0, %c0_i32, %arg1 : i32, i32, i32
  }
  func.func @transform_1(%arg0: i32, %arg1: i32) -> (i32, i32, i32, i32) {
    %c0_i32 = arith.constant 0 : i32
    %c0_i32_0 = arith.constant 0 : i32
    %c0_i32_1 = arith.constant 0 : i32
    return %arg0, %arg1, %c0_i32, %c0_i32_0 : i32, i32, i32, i32
  }
  func.func @transform_2(%arg0: i32, %arg1: i32) -> (i32, i32) {
    %c0_i32 = arith.constant 0 : i32
    %c0_i32_0 = arith.constant 0 : i32
    %c0_i32_1 = arith.constant 0 : i32
    return %c0_i32, %c0_i32_0 : i32, i32
  }
  func.func @transform_3(%arg0: i32, %arg1: i32) -> (i32, i32) {
    %c0_i32 = arith.constant 0 : i32
    %c0_i32_0 = arith.constant 0 : i32
    %c0_i32_1 = arith.constant 0 : i32
    return %c0_i32, %c0_i32_0 : i32, i32
  }
  func.func @transform_4(%arg0: i32, %arg1: i32) -> (i32, i32) {
    %c0_i32 = arith.constant 0 : i32
    %c0_i32_0 = arith.constant 0 : i32
    %c0_i32_1 = arith.constant 0 : i32
    return %c0_i32, %c0_i32_0 : i32, i32
  }
  func.func @transform_5(%arg0: i32, %arg1: i32) -> (i32, i32) {
    %c0_i32 = arith.constant 0 : i32
    %c0_i32_0 = arith.constant 0 : i32
    %c0_i32_1 = arith.constant 0 : i32
    return %c0_i32, %c0_i32_0 : i32, i32
  }
  func.func @transform_6(%arg0: i32, %arg1: i32) -> (i32, i32, i32) {
    %c0_i32 = arith.constant 0 : i32
    %c0_i32_0 = arith.constant 0 : i32
    return %arg0, %c0_i32, %arg1 : i32, i32, i32
  }
}

</mosaic_0001>

<bundles_post_ra>
// kernel: seanet_resnet_block.1
= control target key start
LH: loop header
LB: loop body
LE: loop exit
PB: predicated region body
PF: predicated region fallthrough
CT: control target
= control target key end

     0   :  { %11 = vsyncpa [#allocation3], 0  ;;  %s1073_s0 = inlined_call_operand.vmem [shape: f32[2,8,128], index: 0, kind: input, shape index: {}]   ;;  %s1074_s1 = inlined_call_operand.vmem [shape: f32[2,1,8,2], index: 1, kind: input, shape index: {}]   ;;  %s1075_s2 = inlined_call_operand.vmem [shape: f32[12,8], index: 2, kind: input, shape index: {}]   ;;  %s1076_s3 = inlined_call_operand.vmem [shape: f32[4,1], index: 3, kind: input, shape index: {}]   ;;  %s1077_s4 = inlined_call_operand.vmem [shape: f32[8,4], index: 4, kind: input, shape index: {}]   ;;  %s1078_s5 = inlined_call_operand.vmem [shape: f32[8,1], index: 5, kind: input, shape index: {}]   ;;  %s1079_s6 = inlined_call_operand.hbm [shape: f32[2,8,128], index: 6, kind: output, shape index: {}]  }
   0x1   :  { %13 = vsyncpa [#allocation3 + $0x1], 0  ;;  %s933_s21 = smov 0   ;;  %s935_s22 = smov 0  }
   0x2   :  { %s937_s23 = smov 0   ;;  %s939_s24 = smov 0  }
   0x3   :  { %s941_s25 = smov 0   ;;  %s943_s26 = smov 0  }
   0x4 LB: > { %s696_s27 = sadd.s32 4294967295, %s889_s26   ;;  %s697_s28 = sadd.s32 4294967294, %s889_s26   ;;  %s889_s26 = sphi %s943_s26, %s19_s26   ;;  %s885_s25 = sphi %s941_s25, %s1086_s25   ;;  %s881_s24 = sphi %s939_s24, %s1085_s24   ;;  %s877_s23 = sphi %s937_s23, %s1084_s23   ;;  %s873_s22 = sphi %s935_s22, %s1083_s22   ;;  %s869_s21 = sphi %s933_s21, %s1082_s21  }
   0x5   : > { %s31_s29 = sadd.s32 1, %s885_s25  ;;  %s180_s30 = sadd.s32 1, %s877_s23 }
   0x6   : > { %p33_p0 = scmp.ge.s32.totalorder %s31_s29, 2  ;;  %p190_p1 = scmp.ne.s32.totalorder %s877_s23, %s873_s22 }
   0x7   : > { %p191_p2 = scmp.eq.s32.totalorder %s696_s27, 1  ;;  %p196_p3 = scmp.ne.s32.totalorder %s873_s22, %s869_s21 }
   0x8   : > { %s1088_s29 = smov (%p33_p0, %s31_s29), 0  ;;  %p197_p5 = scmp.eq.s32.totalorder %s697_s28, 1 }
   0x9   : > { %p973_p4 = por %p191_p2, %p190_p1  ;;  %s175_s8 = ssub.s32 %s885_s25, %s1088_s29 }
   0xa   : > { %p700_p6 = scmp.ge.s32.totalorder %s889_s26, 1  ;;  %p178_p7 = scmp.eq.s32.totalorder %s175_s8, 0 }
   0xb   : > { %p980_p8 = por %p197_p5, %p196_p3  ;;  %p247_p9 = scmp.lt.s32.totalorder %s889_s26, 3 }
   0xc   : > { %s986_s10 = scalar_select %p178_p7, %s877_s23, %s180_s30  }
   0xd   : > { %p248_p10 = pnand %p700_p6, %p247_p9 }
   0xe   : > { %p286_p11 = scmp.lt.s32.totalorder (!%p248_p10), %s881_s24, 1  ;;  %v312_v0 = vld [vmem:[%s1075_s2] sm:$0xff] (!%p248_p10)  ;;  %vm314_vm0 = vcmask (!%p248_p10), 64512   ;;  %v891_v2 = vmov (!%p248_p10), 0   ;;  %v313_v12 = vld [vmem:[%s1075_s2 + $0x8] sm:$0xf] (!%p248_p10)  ;;  %v475_v21 = vlaneseq (!%p248_p10) }
   0xf   : > { %251 = sbr.rel (%p248_p10) target bundleno = 643 (0x283), region = 44  ;;  %732 = vmatprep.mubr.msk.f32.mxu1 (!%p248_p10), %vm314_vm0, %v312_v0  ;;  %727 = vmatprep.mubr.msk.f32.mxu0 (!%p248_p10), %vm314_vm0, %v312_v0  ;;  %v496_v1 = vld [vmem:[%s1076_s3] sm:$0xf] (!%p248_p10)  ;;  %s892_s11 = smov (!%p248_p10), 1   ;;  %v893_v18 = vmov (!%p248_p10), 1   ;;  %v895_v19 = vmov (!%p248_p10), 0.0  }
  0x10   : > { %803 = vset.pattern.permute.xlu1 (!%p248_p10), %v891_v2  ;;  %801 = vset.pattern.permute.xlu0 (!%p248_p10), %v891_v2  ;;  %s894_s12 = smov (!%p248_p10), 127   ;;  %vm896_vm3 = vmmov (!%p248_p10), 0   ;;  %v509_v20 = vld [vmem:[%s1078_s5] sm:$0xff] (!%p248_p10)  ;;  %v476_v23 = vand.u32 (!%p248_p10), 127, %v475_v21  ;;  %vm519_vm6 = vcmask (!%p248_p10), 1043456   ;;  %vm515_vm8 = vcmask (!%p248_p10), 31744  }
  0x11   : > { %499 = vperm.xlu1 (!%p248_p10), %803, %v496_v1   ;;  %v508_v37 = vld [vmem:[%s1077_s4] sm:$0xff] (!%p248_p10)  ;;  %s283_s17 = sand.u32 (!%p248_p10), 1, %s873_s22  }
  0x12   : > { %vm477_vm4 = vcmp.eq.s32.totalorder (!%p248_p10), %v476_v23, 0  ;;  %vm484_vm5 = vcmp.eq.s32.totalorder (!%p248_p10), %v476_v23, 127  ;;  %s701_s18 = sshll.u32 (!%p248_p10), %s283_s17, 3 }
  0x13   : > { %s285_s20 = scalar_lea.vmem (!%p248_p10), [#allocation2], %s701_s18 }
  0x14   : > { %s610_s27 = sshll.u32 (!%p248_p10), %s285_s20, 4  ;;  %s1028_s27 = int_to_ptr.vmem [resolvable:$true] %s610_s27 }
  0x16   : > { %s287_s15 = scalar_select %p286_p11, %s881_s24, 1 }
  0x18   : > { %s702_s16 = sshll.u32 %s287_s15, 3 }
  0x19   : > { %s299_s19 = scalar_lea.vmem %s1074_s1, %s702_s16  ;;  %s292_s28 = scalar_lea.vmem %s1073_s0, %s702_s16 }
  0x1a   : > { %v306_v3 = vld [vmem:[%s299_s19] sm:$0xff]  ;;  %s714_s19 = sshll.u32 %s881_s24, 7  ;;  %s897_s24 = smov [#allocation2]  }
  0x1b   : > { %v1004_v4 = vld [vmem:[%s292_s28] sm:$0xff]  ;;  %v308_v5 = vmul.f32 1.442695, %v306_v3  ;;  %vm307_vm1 = vcmp.gt.f32.partialorder %v306_v3, 0.0  ;;  %s1026_s8 = scalar_lea.hbm %s1079_s6, %s714_s19  ;;  %s815_s13 = sshll.u32 %s897_s24, 4  ;;  %s816_s13 = int_to_ptr.vmem [resolvable:$false] %s815_s13 }
  0x1c   : > { %v302_v6 = vmul.f32 1.442695, %v1004_v4  ;;  %vm301_vm2 = vcmp.gt.f32.partialorder %v1004_v4, 0.0  ;;  %s817_s14 = scalar_lea.vmem %s816_s13, 256  ;;  %p818_p1 = scmp.lt.s32.totalorder %s1028_s27, %s816_s13 }
  0x1d   : > { %805 = vpow2.f32 %v308_v5 }
  0x1e   : > { %807 = vpow2.f32 %v302_v6 }
  0x27   : > { %v806_v7 = vpop.eup %805 }
  0x28   : > { %v808_v8 = vpop.eup %807  ;;  %v705_v9 = vadd.f32 -1.0, %v806_v7 }
  0x29   : > { %v704_v10 = vadd.f32 -1.0, %v808_v8 }
  0x2a   : > { %v311_v11 = vsel %vm307_vm1, %v306_v3, %v705_v9 }
  0x2b   : > { %730 = vmatprep.subr.mxu1 %v311_v11  ;;  %v305_v13 = vsel %vm301_vm2, %v1004_v4, %v704_v10 }
  0x2c   : > { %731 = vmatpush3.msra.mxu1 %v311_v11  ;;  %725 = vmatprep.subr.mxu0 %v305_v13 }
  0x2d   : > { %733 = vmatmul.mubr.msk.f32.vlgmr.msra.gmra.mrb[0].mxu1 %vm314_vm0, %v313_v12  ;;  %726 = vmatpush3.msra.mxu0 %v305_v13 }
  0x2e   : > { %728 = vmatmul.mubr.msk.f32.vlgmr.msra.gmra.mrb[0].mxu0 %vm314_vm0, %v313_v12  ;;  %735 = vmatprep.subr.mxu0 %v895_v19 }
  0x2f   : > { %737 = vmatprep.mubr.msk.f32.mxu0 %vm896_vm3, %v895_v19 }
  0x90   : > { %v500_v22 = vpop.permute.xlu1 %499 }
 0x100   : > { %v734_v14 = vpop.f32.mrb[0].mxu1 }
 0x101   : > { %v462_v15 = vpop.f32.mrb[1].mxu1  ;;  %v729_v16 = vpop.f32.mrb[0].mxu0 }
 0x102   : > { %480 = vperm.xlu0 %801, %v462_v15   ;;  %v387_v17 = vpop.f32.mrb[1].mxu0 }
 0x103   : > { %471 = vrot.lane.b32.xlu1 %v387_v17, %s892_s11  ;;  %v492_v27 = vrot.slane %v387_v17, 4  ;;  %s596_s11 = scalar_lea.sflag [#allocation3], %s283_s17 }
 0x106   : > { %802 = vset.pattern.permute.xlu0 %v893_v18 }
 0x107   : > { %487 = vperm.xlu0 %802, %v734_v14   ;;  %473 = vrot.lane.b32.xlu1 %v729_v16, %s894_s12  ;;  %s811_s12 = scalar_lea.vmem %s1028_s27, 128 }
 0x108   : > { %p812_p12 = scmp.ne.s32.totalorder %s1028_s27, %s811_s12  ;;  %p819_p2 = scmp.lt.s32.totalorder %s817_s14, %s811_s12 }
 0x10a   : > { %p813_p13 = pnand %p812_p12, %p973_p4  ;;  %p820_p3 = por %p819_p2, %p818_p1 }
 0x10b   : > { %804 = vset.pattern.permute.xlu0 %v891_v2 }
 0x10c   : > { %512 = vperm.xlu0 %804, %v509_v20   ;;  %p814_p0 = pneg %p813_p13 }
 0x10e   : > { %p821_p5 = pnand %p820_p3, %p814_p0 }
 0x175   : > { %v472_v24 = vpop.permute.xlu1 %471 }
 0x179   : > { %v474_v29 = vpop.permute.xlu1 %473 }
 0x181   : > { %v481_v25 = vpop.permute.xlu0 %480 }
 0x182   : > { %v483_v26 = vsel %vm477_vm4, %v481_v25, %v472_v24 }
 0x183   : > { %v494_v28 = vadd.f32 %v492_v27, %v483_v26 }
 0x186   : > { %v488_v30 = vpop.permute.xlu0 %487 }
 0x187   : > { %v490_v31 = vsel %vm484_vm5, %v488_v30, %v474_v29 }
 0x188   : > { %v495_v32 = vadd.f32 %v494_v28, %v490_v31 }
 0x18a   : > { %v502_v33 = vadd.f32 %v500_v22, %v495_v32 }
 0x18b   : > { %v513_v39 = vpop.permute.xlu0 %512 }
 0x18c   : > { %v504_v34 = vmul.f32 1.442695, %v502_v33  ;;  %vm503_vm7 = vcmp.gt.f32.partialorder %v502_v33, 0.0 }
 0x18e   : > { %809 = vpow2.f32 %v504_v34 }
 0x198   : > { %v810_v35 = vpop.eup %809 }
 0x199   : > { %v710_v36 = vadd.f32 -1.0, %v810_v35 }
 0x19b   : > { %v507_v38 = vsel %vm503_vm7, %v502_v33, %v710_v36 }
 0x19c   : > { %736 = vmatpush3.msk.msra.mxu0 %vm519_vm6, %v507_v38 }
 0x19d   : > { %738 = vmatmul.mubr.msk.f32.vlgmr.msra.gmra.mrb[2].mxu0 %vm515_vm8, %v508_v37 }
 0x270   : > { %v589_v40 = vpop.f32.mrb[2].mxu0 }
 0x271   : > { %v590_v41 = vadd.f32 %v589_v40, %v513_v39  ;;  %v739_v42 = vpop.f32.mrb[3].mxu0 }
 0x273   : > { %v593_v43 = vadd.f32 %v590_v41, %v1004_v4 }
 0x275   : > { %594 = vst [vmem:[%s285_s20] sm:$0xff] %v593_v43 }
 0x276   : > { %824 = shalt.err (!%p821_p5)
}
 0x277   : > { %s825_s15 = scalar_lea.hbm %s1026_s8, 128  ;;  %s829_s18 = scalar_lea.hbm %s1079_s6, 256 }
 0x278   : > { %p826_p6 = scmp.ne.s32.totalorder %s1026_s8, %s825_s15  ;;  %p830_p10 = scmp.lt.u32.totalorder %s1026_s8, %s1079_s6 }
 0x279   : > { %p831_p11 = scmp.lt.u32.totalorder %s829_s18, %s825_s15  ;;  %p833_p13 = scmp.lt.u32.totalorder %s825_s15, %s1026_s8 }
 0x27a   : > { %p827_p7 = pnand %p826_p6, %p973_p4 }
 0x27b   : > { %p832_p12 = por %p831_p11, %p830_p10 }
 0x27c   : > { %p828_p9 = pneg %p827_p7 }
 0x27d   : > { %p834_p0 = por %p833_p13, %p832_p12 }
 0x27f   : > { %p835_p1 = pnand %p834_p0, %p828_p9 }
 0x281   : > { %838 = shalt.err (!%p835_p1)
}
 0x282   : > { %740 = dma.vmem_to_hbm [thread:$0]  (%p973_p4), %s1028_s27, 128, %s1026_s8, %s596_s11  }
 0x283 PF: > { %p746_p2 = scmp.ge.s32.totalorder %s889_s26, 2  ;;  %s622_s28 = sand.u32 1, %s869_s21  }
 0x284   : > { %s623_s30 = scalar_lea.sflag [#allocation3], %s622_s28 }
 0x285   : > { %p743_p3 = pnand %p746_p2, %p980_p8 }
 0x287   : > { %864 = dma.done.wait (!%p743_p3), %s623_s30, 128  }
 0x288   : > { %866 = vsyncadd (!%p743_p3), %s623_s30, 4294967168  ;;  %s19_s26 = sadd.s32 1, %s889_s26   ;;  %s1082_s21 = smov %s873_s22 }
 0x289   : > { %p16_p5 = scmp.ge.s32.totalorder %s19_s26, 4   ;;  %s1083_s22 = smov %s877_s23 }
 0x28a   : > { %s1084_s23 = smov %s986_s10  ;;  %s1085_s24 = smov %s885_s25 }
 0x28b   : > { %s1086_s25 = smov %s1088_s29  ;;  %18 = sbr.rel (!%p16_p5) target bundleno = 4 (0x4), region = 82 }
 0x292   :  { %628 = vsyncpa [#allocation3], 1 }
 0x293   :  { %630 = vsyncpa [#allocation3 + $0x1], 1 }

</bundles_post_ra>
